<compile_context>
chip_gen: v7x
topology: tpu7x:2x2x1
jax: 0.10.0
libtpu: 0.0.40
codegen_flags: <defaults>
</compile_context>

<pallas_src>
import functools

import jax
import jax.numpy as jnp
from jax import lax
from jax.experimental import pallas as pl
from jax.experimental.pallas import tpu as pltpu

_MiB = 1024 * 1024


def _rmsnorm_kernel(x_ref, g_ref, o_ref, *, scale, eps, low_precision_mul):
    # x_ref: (tm, D) tile of rows; g_ref: (1, D) gamma; o_ref: (tm, D)
    x = x_ref[...]
    xf = x.astype(jnp.float32)
    # F.normalize semantics: x / max(||x||, eps) == x * rsqrt(max(||x||^2, eps^2))
    sumsq = jnp.sum(xf * xf, axis=-1, keepdims=True)                 # (tm, 1), f32 accum
    inv_scaled = lax.rsqrt(jnp.maximum(sumsq, eps * eps)) * scale    # EUP, column only
    if low_precision_mul:
        # bf16-VALU path (v6e/v7x): keep full-tile multiplies in input dtype,
        # avoiding a materialized f32 copy of the whole tile.
        o_ref[...] = (
            x * inv_scaled.astype(x.dtype) * g_ref[...].astype(x.dtype)
        ).astype(o_ref.dtype)
    else:
        g = g_ref[...].astype(jnp.float32)
        o_ref[...] = (xf * inv_scaled * g).astype(o_ref.dtype)       # 2 full-tile VPU muls


def _chip_config():
    """Generation-gated VMEM / tile-byte budgets."""
    vmem_cap = 128 * _MiB
    try:
        vmem_cap = int(pltpu.get_tpu_info().vmem_capacity_bytes)
    except Exception:
        pass
    try:
        kind = jax.devices()[0].device_kind.lower()
    except Exception:
        kind = ""
    is_pre_v6 = any(t in kind for t in ("v5 lite", "v5e", "v5lite", "v4", "v3", "v2"))

    if vmem_cap <= 64 * _MiB:
        # v7x: ~3.2 TB/s HBM -> bigger tiles to amortize step overhead, but only
        # 64 MiB physical VMEM, so keep the double-buffered tile set tight.
        cfg = dict(vmem_limit=48 * _MiB, tile_budget=40 * _MiB,
                   target_tile=4 * _MiB, low_precision_ok=True)
    elif is_pre_v6:
        # v5e: slowest HBM (~0.82 TB/s); ~2 MiB tiles already amortize overhead.
        # No bf16 VALU -> keep f32 compute path. Preserve VMEM headroom.
        cfg = dict(vmem_limit=64 * _MiB, tile_budget=48 * _MiB,
                   target_tile=2 * _MiB, low_precision_ok=False)
    else:
        # v6e (128 MiB VMEM, ~1.4 TB/s HBM): large budget keeps block_rows well
        # above the 8-row floor even for very large dims.
        cfg = dict(vmem_limit=96 * _MiB, tile_budget=64 * _MiB,
                   target_tile=2 * _MiB, low_precision_ok=True)

    # Never exceed the part's physical capacity (leave headroom for Mosaic temps).
    cfg["vmem_limit"] = min(cfg["vmem_limit"], (vmem_cap * 3) // 4)
    cfg["tile_budget"] = min(cfg["tile_budget"], (cfg["vmem_limit"] * 5) // 6)
    return cfg


def _pick_block_rows(num_rows, dim, itemsize, cfg):
    if num_rows <= 8:
        return num_rows                      # single full block (block dims == array dims)

    bytes_per_row_in = dim * itemsize
    # 2x in + 2x out double buffers + ~2 f32 temps per element (conservative).
    per_row_vmem = dim * (4 * itemsize + 2 * 4)

    rows_target = max(8, cfg["target_tile"] // max(bytes_per_row_in, 1))
    rows_budget = max(8, cfg["tile_budget"] // max(per_row_vmem, 1))
    rows = min(int(rows_target), int(rows_budget))

    # Guarantee >= 2 grid steps so the "parallel" row axis uses both v7x TCs.
    half_rows = (((num_rows + 1) // 2) + 7) // 8 * 8
    rows = min(rows, half_rows)

    return max(8, (rows // 8) * 8)           # sublane multiple


def rmsnorm_pallas(x, gamma, *, block_rows=None, eps=1e-12):
    """RMSNorm: F.normalize(x, dim=-1) * sqrt(dim) * gamma.

    x: (..., dim); gamma: (dim,). Returns same shape/dtype as x.
    For peak throughput `dim` should be a multiple of 128 (lane-dense stores).
    """
    orig_shape = x.shape
    dim = orig_shape[-1]
    scale = float(dim) ** 0.5

    x2 = x.reshape(-1, dim)                  # contiguous view, no HBM copy
    m = x2.shape[0]
    cfg = _chip_config()
    if block_rows is None:
        block_rows = _pick_block_rows(m, dim, jnp.dtype(x.dtype).itemsize, cfg)

    g2 = gamma.reshape(1, dim)
    low_precision = bool(cfg["low_precision_ok"]) and jnp.dtype(x.dtype).itemsize < 4
    kernel = functools.partial(
        _rmsnorm_kernel, scale=scale, eps=eps, low_precision_mul=low_precision
    )

    out = pl.pallas_call(
        kernel,
        out_shape=jax.ShapeDtypeStruct((m, dim), x.dtype),
        grid_spec=pltpu.PrefetchScalarGridSpec(
            num_scalar_prefetch=0,
            grid=(pl.cdiv(m, block_rows),),   # ragged last block handled by Pallas masking
            in_specs=[
                pl.BlockSpec((block_rows, dim), lambda i: (i, 0)),
                # gamma stays resident (constant block index; a Buffered(1)
                # pipeline_mode could return a sliver of VMEM if ever needed).
                pl.BlockSpec((1, dim), lambda i: (0, 0)),
            ],
            out_specs=pl.BlockSpec((block_rows, dim), lambda i: (i, 0)),
        ),
        compiler_params=pltpu.CompilerParams(
            dimension_semantics=("parallel",),  # shards the row grid across v7x's 2 TCs
            vmem_limit_bytes=cfg["vmem_limit"],
        ),
    )(x2, g2)

    return out.reshape(orig_shape)


if __name__ == "__main__":
    key = jax.random.PRNGKey(0)
    batch, seq, dim = 2, 8, 128   # dim is a multiple of 128 -> lane-dense stores

    kx, kg = jax.random.split(key)
    x = jax.random.normal(kx, (batch, seq, dim), dtype=jnp.float32)
    # PyTorch module initializes gamma to ones; perturb slightly so the gamma
    # multiply is actually exercised.
    gamma = jnp.ones((dim,), dtype=jnp.float32) + 0.01 * jnp.arange(
        dim, dtype=jnp.float32
    )

    out = rmsnorm_pallas(x, gamma)
    out = jax.block_until_ready(out)

    # Reference in plain JAX (mirrors F.normalize(x, dim=-1) * sqrt(dim) * gamma).
    norm = jnp.sqrt(jnp.sum(x.astype(jnp.float32) ** 2, axis=-1, keepdims=True))
    ref = x / jnp.maximum(norm, 1e-12) * (dim ** 0.5) * gamma
    assert jnp.allclose(out, ref, atol=2e-5, rtol=2e-5), "mismatch vs reference"

    print("KERNEL_OK")
</pallas_src>

<mosaic_0001>
module attributes {stable_mosaic.version = 11 : i64} {
  func.func @_rmsnorm_kernel(%arg0: i32, %arg1: memref<8x128xf32, #tpu.memory_space<vmem>>, %arg2: memref<1x128xf32, #tpu.memory_space<vmem>>, %arg3: memref<8x128xf32, #tpu.memory_space<vmem>>) attributes {dimension_semantics = [#tpu.dimension_semantics<parallel>], iteration_bounds = array<i64: 2>, scalar_prefetch = 0 : i64, scratch_operands = 0 : i64, tpu.core_type = #tpu.core_type<tc>, window_params = [{transform_indices = @transform_0, window_bounds = array<i64: 8, 128>}, {pipeline_mode = #tpu.pipeline_mode<synchronous>, transform_indices = @transform_1, window_bounds = array<i64: 1, 128>}, {transform_indices = @transform_2, window_bounds = array<i64: 8, 128>}]} {
    %c0 = arith.constant 0 : index
    %c0_0 = arith.constant 0 : index
    %0 = vector.load %arg1[%c0, %c0_0] : memref<8x128xf32, #tpu.memory_space<vmem>>, vector<8x128xf32>
    %1 = arith.mulf %0, %0 : vector<8x128xf32>
    %cst = arith.constant dense<0.000000e+00> : vector<8xf32>
    %2 = vector.multi_reduction <add>, %1, %cst [1] : vector<8x128xf32> to vector<8xf32>
    %3 = vector.shape_cast %2 : vector<8xf32> to vector<8x1xf32>
    %cst_1 = arith.constant 1.000000e-24 : f32
    %4 = vector.broadcast %cst_1 : f32 to vector<8x1xf32>
    %5 = arith.maximumf %3, %4 : vector<8x1xf32>
    %6 = math.rsqrt %5 : vector<8x1xf32>
    %cst_2 = arith.constant 11.3137083 : f32
    %7 = vector.broadcast %cst_2 : f32 to vector<8x1xf32>
    %8 = arith.mulf %6, %7 : vector<8x1xf32>
    %c0_3 = arith.constant 0 : index
    %c0_4 = arith.constant 0 : index
    %9 = vector.load %arg2[%c0_3, %c0_4] : memref<1x128xf32, #tpu.memory_space<vmem>>, vector<1x128xf32>
    %10 = vector.broadcast %8 : vector<8x1xf32> to vector<8x128xf32>
    %11 = arith.mulf %0, %10 : vector<8x128xf32>
    %12 = vector.broadcast %9 : vector<1x128xf32> to vector<8x128xf32>
    %13 = arith.mulf %11, %12 : vector<8x128xf32>
    %c0_5 = arith.constant 0 : index
    %c0_6 = arith.constant 0 : index
    %14 = vector.load %arg3[%c0_5, %c0_6] : memref<8x128xf32, #tpu.memory_space<vmem>>, vector<8x128xf32>
    tpu.vector_store %arg3[%c0_5, %c0_6], %13 {strides = array<i32>} : memref<8x128xf32, #tpu.memory_space<vmem>>, vector<8x128xf32>,
    return
  }
  func.func @transform_0(%arg0: i32) -> (i32, i32) {
    %c0_i32 = arith.constant 0 : i32
    %c0_i32_0 = arith.constant 0 : i32
    return %arg0, %c0_i32 : i32, i32
  }
  func.func @transform_1(%arg0: i32) -> (i32, i32) {
    %c0_i32 = arith.constant 0 : i32
    %c0_i32_0 = arith.constant 0 : i32
    %c0_i32_1 = arith.constant 0 : i32
    return %c0_i32, %c0_i32_0 : i32, i32
  }
  func.func @transform_2(%arg0: i32) -> (i32, i32) {
    %c0_i32 = arith.constant 0 : i32
    %c0_i32_0 = arith.constant 0 : i32
    return %arg0, %c0_i32 : i32, i32
  }
}

</mosaic_0001>

<bundles_post_ra>
// kernel: tpu_custom_call.1
= control target key start
LH: loop header
LB: loop body
LE: loop exit
PB: predicated region body
PF: predicated region fallthrough
CT: control target
= control target key end

     0   :  { %7 = vsyncpa [#allocation3], 0  ;;  %s706_s0 = inlined_call_operand.hbm [shape: f32[16,128], index: 0, kind: input, shape index: {}]   ;;  %s707_s1 = inlined_call_operand.hbm [shape: f32[1,128], index: 1, kind: input, shape index: {}]   ;;  %s708_s2 = inlined_call_operand.hbm [shape: f32[16,128], index: 2, kind: output, shape index: {}]  }
   0x1   :  { %9 = vsyncpa [#allocation3 + $0x1], 0 }
   0x2   :  { %10 = vsyncpa [#allocation6], 0 }
   0x3   :  { %11 = vsyncpa [#allocation4], 0 }
   0x4   :  { %13 = vsyncpa [#allocation4 + $0x1], 0  ;;  %s505_s9 = smov 0   ;;  %s507_s10 = smov 0  }
   0x5   :  { %s509_s11 = smov 0   ;;  %s511_s12 = smov 0  }
   0x6 LB: > { %s526_s13 = sadd.s32 4294967295, %s485_s12   ;;  %s283_s14 = sadd.s32 4294967294, %s485_s12   ;;  %s485_s12 = sphi %s511_s12, %s732_s12   ;;  %s481_s11 = sphi %s509_s11, %s731_s11   ;;  %s477_s10 = sphi %s507_s10, %s730_s10   ;;  %s473_s9 = sphi %s505_s9, %s729_s9  }
   0x7   : > { %p39_p0 = scmp.ne.s32.totalorder %s477_s10, %s473_s9  ;;  %p709_p1 = scmp.eq.s32.totalorder %s526_s13, 0 }
   0x8   : > { %p90_p3 = scmp.eq.s32.totalorder %s283_s14, 1  ;;  %p284_p5 = scmp.ge.s32.totalorder %s485_s12, 1 }
   0x9   : > { %p535_p4 = por %p709_p1, %p39_p0  ;;  %p97_p7 = scmp.lt.s32.totalorder %s485_s12, 3 }
   0xa   : > { %p540_p6 = por %p90_p3, %p39_p0  ;;  %s487_s18 = smov [#allocation5]  }
   0xb   : > { %s712_s15 = scalar_select %p535_p4, 1, 0 }
   0xc   : > { %s713_s16 = scalar_select %p540_p6, 1, 0 }
   0xd   : > { %p545_p8 = pnand %p284_p5, %p97_p7  ;;  %s110_s19 = sshll.u32 %s487_s18, 4  ;;  %s111_s19 = int_to_ptr.vmem [resolvable:$true] %s110_s19 }
   0xe   : > { %s553_s20 = sadd.s32 1, %s485_s12   ;;  %s26_s24 = sadd.s32 1, %s481_s11 }
   0xf   : > { %s714_s17 = scalar_select %p545_p8, 1, 0 }
  0x10   : > { %p306_p10 = pneg %p545_p8  ;;  %s23_s22 = ssub.s32 %s485_s12, %s553_s20 }
  0x11   : > { %p563_p12 = scmp.eq.s32.totalorder %s23_s22, 0  ;;  %s357_s27 = scalar_lea.hbm %s707_s1, 16 }
  0x12   : > { %p557_p11 = pnand %p306_p10, %p709_p1  ;;  %p358_p0 = scmp.ne.s32.totalorder %s707_s1, %s357_s27 }
  0x13   : > { %s716_s23 = scalar_select %p563_p12, 1, 0 }
  0x14   : > { %p359_p3 = pneg %p557_p11  ;;  %p364_p10 = scmp.lt.u32.totalorder %s357_s27, %s707_s1 }
  0x16   : > { %p360_p5 = pnand %p359_p3, %p358_p0 }
  0x18   : > { %p361_p7 = pneg %p360_p5 }
  0x1a   : > { %p366_p9 = pnand %p364_p10, %p361_p7 }
  0x1c   : > { %369 = shalt.err (!%p366_p9)
}
  0x1d   : > { %s370_s4 = scalar_lea.vmem %s111_s19, 16  ;;  %s377_s5 = scalar_lea.vmem %s111_s19, 32 }
  0x1e   : > { %p371_p1 = scmp.ne.s32.totalorder %s111_s19, %s370_s4  ;;  %p378_p6 = scmp.lt.s32.totalorder %s111_s19, %s111_s19 }
  0x1f   : > { %p379_p4 = scmp.lt.s32.totalorder %s377_s5, %s370_s4 }
  0x20   : > { %p373_p2 = pnand %p371_p1, %p359_p3 }
  0x21   : > { %p380_p8 = por %p379_p4, %p378_p6 }
  0x22   : > { %p374_p13 = pneg %p373_p2 }
  0x24   : > { %p381_p12 = pnand %p380_p8, %p374_p13 }
  0x26   : > { %384 = shalt.err (!%p381_p12)
}
  0x27   : > { %309 = dma.hbm_to_vmem [thread:$0]  (!%p557_p11), %s707_s1, 16, %s111_s19, [#allocation6]  }
  0x28   : > { %p717_p1 = scmp.ne.s32.totalorder %s716_s23, 0  ;;  %p34_p2 = scmp.eq.s32.totalorder %s485_s12, 0 }
  0x29   : > { %p718_p4 = scmp.ne.s32.totalorder %s481_s11, %s477_s10  ;;  %p719_p6 = scmp.eq.s32.totalorder %s526_s13, 1 }
  0x2a   : > { %s589_s8 = scalar_select %p717_p1, %s481_s11, %s26_s24  }
  0x2b   : > { %p597_p8 = por %p719_p6, %p718_p4  ;;  %p319_p9 = scmp.lt.s32.totalorder %s485_s12, 2 }
  0x2c   : > { %s121_s18 = sand.u32 1, %s481_s11   ;;  %p721_p12 = pmov %p718_p4 }
  0x2d   : > { %s287_s21 = sshll.u32 %s121_s18, 3  ;;  %s288_s22 = sshll.u32 %s485_s12, 7 }
  0x2e   : > { %p35_p13 = por %p34_p2, %p721_p12  ;;  %s610_s19 = scalar_lea.hbm %s706_s0, %s288_s22 }
  0x2f   : > { %s125_s23 = scalar_lea.vmem [#allocation2], %s287_s21  ;;  %s122_s28 = scalar_lea.sflag [#allocation3], %s121_s18 }
  0x30   : > { %s132_s24 = sshll.u32 %s125_s23, 4  ;;  %p612_p11 = pnand %p319_p9, %p35_p13  ;;  %s616_s24 = int_to_ptr.vmem [resolvable:$true] %s132_s24 }
  0x31   : > { %s385_s29 = scalar_lea.hbm %s610_s19, 128  ;;  %s390_s4 = scalar_lea.hbm %s706_s0, 256 }
  0x32   : > { %p386_p0 = scmp.ne.s32.totalorder %s610_s19, %s385_s29  ;;  %p387_p3 = pneg %p612_p11 }
  0x33   : > { %p391_p10 = scmp.lt.u32.totalorder %s610_s19, %s706_s0  ;;  %p392_p1 = scmp.lt.u32.totalorder %s390_s4, %s385_s29 }
  0x34   : > { %p388_p5 = pnand %p387_p3, %p386_p0  ;;  %p394_p4 = scmp.lt.u32.totalorder %s385_s29, %s610_s19 }
  0x35   : > { %p393_p2 = por %p392_p1, %p391_p10 }
  0x36   : > { %p389_p7 = pneg %p388_p5 }
  0x37   : > { %p395_p6 = por %p394_p4, %p393_p2 }
  0x39   : > { %p396_p9 = pnand %p395_p6, %p389_p7 }
  0x3b   : > { %399 = shalt.err (!%p396_p9)
}
  0x3c   : > { %s400_s7 = scalar_lea.vmem %s616_s24, 128  ;;  %s488_s18 = smov [#allocation2]  }
  0x3d   : > { %p401_p12 = scmp.ne.s32.totalorder %s616_s24, %s400_s7  ;;  %s405_s21 = sshll.u32 %s488_s18, 4  ;;  %s406_s21 = int_to_ptr.vmem [resolvable:$false] %s405_s21 }
  0x3e   : > { %s407_s22 = scalar_lea.vmem %s406_s21, 256  ;;  %p408_p5 = scmp.lt.s32.totalorder %s616_s24, %s406_s21 }
  0x3f   : > { %p403_p13 = pnand %p401_p12, %p387_p3  ;;  %p409_p10 = scmp.lt.s32.totalorder %s407_s22, %s400_s7 }
  0x41   : > { %p404_p0 = pneg %p403_p13  ;;  %p410_p1 = por %p409_p10, %p408_p5 }
  0x43   : > { %p411_p2 = pnand %p410_p1, %p404_p0 }
  0x45   : > { %414 = shalt.err (!%p411_p2)
}
  0x46   : > { %313 = dma.hbm_to_vmem [thread:$0]  (!%p612_p11), %s610_s19, 128, %s616_s24, %s122_s28  }
  0x47   : > { %p723_p7 = scmp.ne.s32.totalorder %s714_s17, 0 }
  0x48   : > { %s646_s25 = sand.u32 (!%p723_p7), 1, %s477_s10   ;;  %p724_p3 = scmp.ne.s32.totalorder (!%p723_p7), %s712_s15, 0 }
  0x49   : > { %141 = sbr.rel (%p723_p7) target bundleno = 262 (0x106), region = 28  ;;  %s290_s26 = sshll.u32 (!%p723_p7), %s646_s25, 3 }
  0x4a   : > { %s144_s23 = scalar_lea.sflag (!%p723_p7), [#allocation3], %s646_s25  ;;  %s147_s29 = scalar_lea.vmem (!%p723_p7), [#allocation2], %s290_s26 }
  0x50   : > { %460 = dma.done.wait (%p724_p3), %s144_s23, 128  }
  0x51   : > { %462 = vsyncadd (%p724_p3), %s144_s23, 4294967168  ;;  %p725_p4 = scmp.eq.s32.totalorder %s526_s13, 0 }
  0x53   : > { %464 = dma.done.wait (%p725_p4), [#allocation6], 16   ;;  %p726_p11 = pmov %p725_p4 }
  0x54   : > { %v172_v0 = vld [vmem:[%s147_s29] sm:$0xff]  ;;  %v293_v6 = vld [vmem:[#allocation5] ss:$0 sm:$0xff]  ;;  %s295_s15 = sshll.u32 %s526_s13, 7  ;;  %s171_s17 = scalar_lea.vmem [#allocation7], %s290_s26 }
  0x55   : > { %466 = vsyncadd (%p726_p11), [#allocation6], 4294967280  ;;  %v173_v1 = vmul.f32 %v172_v0, %v172_v0  ;;  %s203_s19 = sshll.u32 %s171_s17, 4  ;;  %s662_s28 = scalar_lea.hbm %s708_s2, %s295_s15  ;;  %s664_s19 = int_to_ptr.vmem [resolvable:$true] %s203_s19 }
  0x56   : > { %s190_s30 = scalar_lea.sflag [#allocation4], %s646_s25  ;;  %s415_s3 = scalar_lea.vmem %s664_s19, 128 }
  0x57   : > { %174 = vadd.xlane.f32.xlu0 %v173_v1  ;;  %p416_p6 = scmp.ne.s32.totalorder %s664_s19, %s415_s3  ;;  %s489_s13 = smov [#allocation7]  }
  0x58   : > { %s419_s4 = sshll.u32 %s489_s13, 4  ;;  %s420_s4 = int_to_ptr.vmem [resolvable:$false] %s419_s4 }
  0x59   : > { %p417_p9 = pnand %p416_p6, %p597_p8  ;;  %s421_s5 = scalar_lea.vmem %s420_s4, 256 }
  0x5a   : > { %p422_p13 = scmp.lt.s32.totalorder %s664_s19, %s420_s4  ;;  %p423_p0 = scmp.lt.s32.totalorder %s421_s5, %s415_s3 }
  0x5b   : > { %p418_p12 = pneg %p417_p9 }
  0x5c   : > { %p424_p5 = por %p423_p0, %p422_p13 }
  0x5e   : > { %p425_p10 = pnand %p424_p5, %p418_p12 }
  0xe4   : > { %v175_v2 = vpop.xlane.xlu0 %174 }
  0xe5   : > { %v176_v3 = vmax.f32 %v175_v2, 1e-24 }
  0xe7   : > { %355 = vrsqrt.f32 %v176_v3 }
  0xf1   : > { %v356_v4 = vpop.eup %355 }
  0xf2   : > { %v178_v5 = vmul.f32 11.313708, %v356_v4 }
  0xf4   : > { %v180_v7 = vmul.f32 %v178_v5, %v172_v0 }
  0xf6   : > { %v187_v8 = vmul.f32 %v293_v6, %v180_v7 }
  0xf8   : > { %188 = vst [vmem:[%s171_s17] sm:$0xff] %v187_v8 }
  0xf9   : > { %428 = shalt.err (!%p425_p10)
}
  0xfa   : > { %s429_s6 = scalar_lea.hbm %s662_s28, 128  ;;  %s433_s21 = scalar_lea.hbm %s708_s2, 256 }
  0xfb   : > { %p430_p1 = scmp.ne.s32.totalorder %s662_s28, %s429_s6  ;;  %p434_p3 = scmp.lt.u32.totalorder %s662_s28, %s708_s2 }
  0xfc   : > { %p435_p4 = scmp.lt.u32.totalorder %s433_s21, %s429_s6  ;;  %p437_p6 = scmp.lt.u32.totalorder %s429_s6, %s662_s28 }
  0xfd   : > { %p431_p2 = pnand %p430_p1, %p597_p8 }
  0xfe   : > { %p436_p11 = por %p435_p4, %p434_p3 }
  0xff   : > { %p432_p7 = pneg %p431_p2 }
 0x100   : > { %p438_p9 = por %p437_p6, %p436_p11 }
 0x102   : > { %p439_p12 = pnand %p438_p9, %p432_p7 }
 0x104   : > { %442 = shalt.err (!%p439_p12)
}
 0x105   : > { %304 = dma.vmem_to_hbm [thread:$0]  (%p597_p8), %s664_s19, 128, %s662_s28, %s190_s30  }
 0x106 PF: > { %s215_s26 = sand.u32 1, %s473_s9   ;;  %p727_p13 = scmp.ne.s32.totalorder %s713_s16, 0 }
 0x107   : > { %p728_p0 = scmp.ge.s32.totalorder %s485_s12, 2  ;;  %s216_s23 = scalar_lea.sflag [#allocation4], %s215_s26 }
 0x109   : > { %p315_p5 = pnand %p728_p0, %p727_p13 }
 0x10b   : > { %468 = dma.done.wait (!%p315_p5), %s216_s23, 128  }
 0x10c   : > { %470 = vsyncadd (!%p315_p5), %s216_s23, 4294967168  ;;  %p16_p10 = scmp.ge.s32.totalorder %s553_s20, 4   ;;  %s729_s9 = smov %s477_s10 }
 0x10d   : > { %s730_s10 = smov %s481_s11  ;;  %s731_s11 = smov %s589_s8 }
 0x10e   : > { %s732_s12 = smov %s553_s20  ;;  %18 = sbr.rel (!%p16_p10) target bundleno = 6 (0x6), region = 77 }
 0x115   :  { %221 = vsyncpa [#allocation3], 1 }
 0x116   :  { %223 = vsyncpa [#allocation3 + $0x1], 1 }
 0x117   :  { %224 = vsyncpa [#allocation6], 1 }
 0x118   :  { %225 = vsyncpa [#allocation4], 1 }
 0x119   :  { %227 = vsyncpa [#allocation4 + $0x1], 1 }

</bundles_post_ra>
